<compile_context>
chip_gen: v5e
topology: v5e:2x2
jax: 0.10.0
libtpu: 0.0.40
codegen_flags: <defaults>
</compile_context>

<pallas_src>
import functools
import math

import jax
import jax.numpy as jnp
from jax.experimental import pallas as pl
from jax.experimental.pallas import tpu as pltpu

# Keep f32 matmuls genuinely f32 on the MXU so the Pallas kernels and the pure-JAX
# reference agree tightly.
jax.config.update("jax_default_matmul_precision", "float32")


# ---------------------------------------------------------------------------
# helpers
# ---------------------------------------------------------------------------
def _pick_tile(dim, preferred, align):
    """Largest tile <= preferred that divides `dim` and is `align`-aligned;
    fall back to the full dimension (always BlockSpec-legal)."""
    if dim <= preferred:
        return dim
    t = (preferred // align) * align
    while t >= align:
        if dim % t == 0:
            return t
        t -= align
    return dim


def _erf(x):
    # Abramowitz & Stegun 7.1.26 polynomial (max abs err ~1.5e-7).  Only uses
    # VPU/EUP-friendly ops (abs, mul/add, exp, select) so it lowers cleanly in
    # Mosaic and matches the exact-erf BERT gelu to f32-level accuracy.
    a1, a2, a3, a4, a5 = 0.254829592, -0.284496736, 1.421413741, -1.453152027, 1.061405429
    p = 0.3275911
    ax = jnp.abs(x)
    t = 1.0 / (1.0 + p * ax)
    poly = ((((a5 * t + a4) * t + a3) * t + a2) * t + a1) * t
    y = 1.0 - poly * jnp.exp(-ax * ax)
    return jnp.where(x < 0.0, -y, y)


def _gelu(x):
    return x * 0.5 * (1.0 + _erf(x * (1.0 / math.sqrt(2.0))))


# ---------------------------------------------------------------------------
# kernel 1: tiled linear (x @ W_torch^T + b), optional fused gelu
# ---------------------------------------------------------------------------
def _linear_kernel(x_ref, w_ref, b_ref, o_ref, acc_ref, *, activation):
    k = pl.program_id(2)

    @pl.when(k == 0)
    def _():
        acc_ref[...] = jnp.zeros_like(acc_ref)

    # PyTorch weight layout (out, in): contract x's feature dim against the
    # weight's "in" dim directly -- no wrapper transpose / extra HBM pass.
    acc_ref[...] += jax.lax.dot_general(
        x_ref[...], w_ref[...],
        dimension_numbers=(((1,), (1,)), ((), ())),
        preferred_element_type=jnp.float32)

    @pl.when(k == pl.num_programs(2) - 1)
    def _():
        y = acc_ref[...] + b_ref[...].astype(jnp.float32)
        if activation == "gelu":
            y = _gelu(y)
        o_ref[...] = y.astype(o_ref.dtype)


def pallas_linear(x, weight, bias, activation=None,
                  row_tile=256, out_tile=256, k_tile=512):
    """y = act(x @ weight.T + bias); x: (R, K), weight: (O, K) PyTorch layout."""
    R, K = x.shape
    O = weight.shape[0]
    tr = _pick_tile(R, row_tile, 8)
    tn = _pick_tile(O, out_tile, 128)
    tk = _pick_tile(K, k_tile, 128)
    grid = (R // tr, O // tn, K // tk)
    kernel = functools.partial(_linear_kernel, activation=activation)
    return pl.pallas_call(
        kernel,
        out_shape=jax.ShapeDtypeStruct((R, O), x.dtype),
        grid_spec=pltpu.PrefetchScalarGridSpec(
            num_scalar_prefetch=0,
            grid=grid,
            in_specs=[
                pl.BlockSpec((tr, tk), lambda i, j, k: (i, k)),
                pl.BlockSpec((tn, tk), lambda i, j, k: (j, k)),
                pl.BlockSpec((1, tn), lambda i, j, k: (0, j)),
            ],
            out_specs=pl.BlockSpec((tr, tn), lambda i, j, k: (i, j)),
            scratch_shapes=[pltpu.VMEM((tr, tn), jnp.float32)],
        ),
        compiler_params=pltpu.CompilerParams(
            dimension_semantics=("parallel", "parallel", "arbitrary")),
    )(x, weight, bias.reshape(1, O))


# ---------------------------------------------------------------------------
# kernel 2: graph ("sim") attention with additive bias
# ---------------------------------------------------------------------------
def _sim_attention_kernel(q_ref, k_ref, v_ref, bias_ref, o_ref, *, scale):
    q = q_ref[...].astype(jnp.float32)      # (tb, L, d)
    k = k_ref[...].astype(jnp.float32)
    v = v_ref[...].astype(jnp.float32)
    s = jnp.einsum("bqd,bkd->bqk", q, k, preferred_element_type=jnp.float32)
    s = s * scale + bias_ref[...].astype(jnp.float32)
    s = s - jnp.max(s, axis=-1, keepdims=True)
    p = jnp.exp(s)
    p = p / jnp.sum(p, axis=-1, keepdims=True)
    o = jnp.einsum("bqk,bkd->bqd", p, v, preferred_element_type=jnp.float32)
    o_ref[...] = o.astype(o_ref.dtype)


def pallas_sim_attention(q, k, v, bias, scale, bh_tile=32):
    BH, L, D = q.shape
    tb = _pick_tile(BH, bh_tile, 8)
    grid = (BH // tb,)
    kernel = functools.partial(_sim_attention_kernel, scale=scale)
    return pl.pallas_call(
        kernel,
        out_shape=jax.ShapeDtypeStruct((BH, L, D), q.dtype),
        grid_spec=pltpu.PrefetchScalarGridSpec(
            num_scalar_prefetch=0,
            grid=grid,
            in_specs=[
                pl.BlockSpec((tb, L, D), lambda i: (i, 0, 0)),
                pl.BlockSpec((tb, L, D), lambda i: (i, 0, 0)),
                pl.BlockSpec((tb, L, D), lambda i: (i, 0, 0)),
                pl.BlockSpec((tb, L, L), lambda i: (i, 0, 0)),
            ],
            out_specs=pl.BlockSpec((tb, L, D), lambda i: (i, 0, 0)),
        ),
        compiler_params=pltpu.CompilerParams(
            dimension_semantics=("parallel",)),
    )(q, k, v, bias)


# ---------------------------------------------------------------------------
# kernel 3: sequence attention with relative-position key/value terms
# ---------------------------------------------------------------------------
def _rel_attention_kernel(q_ref, k_ref, v_ref, rk_ref, rv_ref, bias_ref, o_ref, *, scale):
    q = q_ref[...].astype(jnp.float32)      # (tb, S, d)
    k = k_ref[...].astype(jnp.float32)
    v = v_ref[...].astype(jnp.float32)
    rk = rk_ref[...].astype(jnp.float32)    # (S, S, d)
    rv = rv_ref[...].astype(jnp.float32)
    s = jnp.einsum("bqd,bkd->bqk", q, k, preferred_element_type=jnp.float32)
    # relative key term: s_rel[b,q,k] = sum_d q[b,q,d] * rk[q,k,d]
    s_rel = jnp.sum(q[:, :, None, :] * rk[None, :, :, :], axis=-1)
    s = (s + s_rel) * scale + bias_ref[...].astype(jnp.float32)   # bias (tb, 1, S)
    s = s - jnp.max(s, axis=-1, keepdims=True)
    p = jnp.exp(s)
    p = p / jnp.sum(p, axis=-1, keepdims=True)
    o = jnp.einsum("bqk,bkd->bqd", p, v, preferred_element_type=jnp.float32)
    # relative value term: o_rel[b,q,d] = sum_k p[b,q,k] * rv[q,k,d]
    o_rel = jnp.sum(p[:, :, :, None] * rv[None, :, :, :], axis=2)
    o_ref[...] = (o + o_rel).astype(o_ref.dtype)


def pallas_rel_attention(q, k, v, rel_k, rel_v, bias, scale, bh_tile=32):
    BH, S, D = q.shape
    tb = _pick_tile(BH, bh_tile, 8)
    grid = (BH // tb,)
    kernel = functools.partial(_rel_attention_kernel, scale=scale)
    return pl.pallas_call(
        kernel,
        out_shape=jax.ShapeDtypeStruct((BH, S, D), q.dtype),
        grid_spec=pltpu.PrefetchScalarGridSpec(
            num_scalar_prefetch=0,
            grid=grid,
            in_specs=[
                pl.BlockSpec((tb, S, D), lambda i: (i, 0, 0)),
                pl.BlockSpec((tb, S, D), lambda i: (i, 0, 0)),
                pl.BlockSpec((tb, S, D), lambda i: (i, 0, 0)),
                pl.BlockSpec((S, S, D), lambda i: (0, 0, 0)),
                pl.BlockSpec((S, S, D), lambda i: (0, 0, 0)),
                pl.BlockSpec((tb, 1, S), lambda i: (i, 0, 0)),
            ],
            out_specs=pl.BlockSpec((tb, S, D), lambda i: (i, 0, 0)),
        ),
        compiler_params=pltpu.CompilerParams(
            dimension_semantics=("parallel",)),
    )(q, k, v, rel_k, rel_v, bias)


# ---------------------------------------------------------------------------
# kernel 4: fused residual add + LayerNorm
# ---------------------------------------------------------------------------
def _add_ln_kernel(x_ref, r_ref, g_ref, b_ref, o_ref, *, eps):
    v = x_ref[...].astype(jnp.float32) + r_ref[...].astype(jnp.float32)
    mean = jnp.mean(v, axis=-1, keepdims=True)
    c = v - mean
    var = jnp.mean(c * c, axis=-1, keepdims=True)
    y = c * jax.lax.rsqrt(var + eps)
    y = y * g_ref[...].astype(jnp.float32) + b_ref[...].astype(jnp.float32)
    o_ref[...] = y.astype(o_ref.dtype)


def pallas_add_layernorm(x, resid, gamma, beta, eps, row_tile=512):
    R, H = x.shape
    tr = _pick_tile(R, row_tile, 8)
    grid = (R // tr,)
    kernel = functools.partial(_add_ln_kernel, eps=eps)
    return pl.pallas_call(
        kernel,
        out_shape=jax.ShapeDtypeStruct((R, H), x.dtype),
        grid_spec=pltpu.PrefetchScalarGridSpec(
            num_scalar_prefetch=0,
            grid=grid,
            in_specs=[
                pl.BlockSpec((tr, H), lambda i: (i, 0)),
                pl.BlockSpec((tr, H), lambda i: (i, 0)),
                pl.BlockSpec((1, H), lambda i: (0, 0)),
                pl.BlockSpec((1, H), lambda i: (0, 0)),
            ],
            out_specs=pl.BlockSpec((tr, H), lambda i: (i, 0)),
        ),
        compiler_params=pltpu.CompilerParams(
            dimension_semantics=("parallel",)),
    )(x, resid, gamma.reshape(1, H), beta.reshape(1, H))


# ---------------------------------------------------------------------------
# model orchestration (faithful to the PyTorch forward; reshapes are XLA glue)
# ---------------------------------------------------------------------------
def _relative_position_table(table, length, max_rel):
    r = jnp.arange(length)
    dist = r[None, :] - r[:, None]
    idx = jnp.clip(dist, -max_rel, max_rel) + max_rel
    return table[idx]                              # (Lq, Lk, head_dim)


def _split_heads(x, batch, length, num_heads, head_dim):
    x = x.reshape(batch, length, num_heads, head_dim)
    return jnp.transpose(x, (0, 2, 1, 3)).reshape(batch * num_heads, length, head_dim)


def _merge_heads(x, batch, length, num_heads, head_dim):
    x = x.reshape(batch, num_heads, length, head_dim)
    return jnp.transpose(x, (0, 2, 1, 3)).reshape(batch, length, num_heads * head_dim)


def bert_graph_layer(lp, hidden_states, sim_bias, seq_bias, fea_shape, cfg):
    b, m, seq, dim = fea_shape
    nH = cfg["num_attention_heads"]
    hd = dim // nH
    scale = 1.0 / math.sqrt(hd)
    eps = cfg["layer_norm_eps"]
    max_rel = cfg["max_relative_position"]

    x_in = hidden_states                                         # (b, m, seq, dim)

    # ---- graph ("sim") attention over the m axis --------------------------
    hs = jnp.transpose(x_in, (0, 2, 1, 3)).reshape(b * seq, m, dim)
    flat = hs.reshape(b * seq * m, dim)
    q = pallas_linear(flat, lp["q_sim_w"], lp["q_sim_b"]).reshape(b * seq, m, dim)
    k = pallas_linear(flat, lp["k_sim_w"], lp["k_sim_b"]).reshape(b * seq, m, dim)
    v = pallas_linear(flat, lp["v_sim_w"], lp["v_sim_b"]).reshape(b * seq, m, dim)
    qh = _split_heads(q, b * seq, m, nH, hd)
    kh = _split_heads(k, b * seq, m, nH, hd)
    vh = _split_heads(v, b * seq, m, nH, hd)
    ctx = pallas_sim_attention(qh, kh, vh, sim_bias, scale)
    ctx = _merge_heads(ctx, b * seq, m, nH, hd)                  # (b*seq, m, dim)

    # ---- sequence attention with relative positions -----------------------
    hs2 = jnp.transpose(ctx.reshape(b, seq, m, dim), (0, 2, 1, 3)).reshape(b * m, seq, dim)
    flat2 = hs2.reshape(b * m * seq, dim)
    q2 = pallas_linear(flat2, lp["q_seq_w"], lp["q_seq_b"]).reshape(b * m, seq, dim)
    k2 = pallas_linear(flat2, lp["k_seq_w"], lp["k_seq_b"]).reshape(b * m, seq, dim)
    v2 = pallas_linear(flat2, lp["v_seq_w"], lp["v_seq_b"]).reshape(b * m, seq, dim)
    qh2 = _split_heads(q2, b * m, seq, nH, hd)
    kh2 = _split_heads(k2, b * m, seq, nH, hd)
    vh2 = _split_heads(v2, b * m, seq, nH, hd)
    rel_k = _relative_position_table(lp["rel_k_table"], seq, max_rel)
    rel_v = _relative_position_table(lp["rel_v_table"], seq, max_rel)
    ctx2 = pallas_rel_attention(qh2, kh2, vh2, rel_k, rel_v, seq_bias, scale)
    ctx2 = _merge_heads(ctx2, b * m, seq, nH, hd)                # (b*m, seq, dim)

    # ---- self-output: dense + residual + LayerNorm ------------------------
    a_flat = ctx2.reshape(b * m * seq, dim)
    d = pallas_linear(a_flat, lp["attn_out_w"], lp["attn_out_b"])
    attn_ln = pallas_add_layernorm(d, x_in.reshape(b * m * seq, dim),
                                   lp["attn_ln_g"], lp["attn_ln_b"], eps)

    # ---- intermediate (fused gelu) + output + residual + LayerNorm --------
    inter = pallas_linear(attn_ln, lp["inter_w"], lp["inter_b"], activation="gelu")
    out = pallas_linear(inter, lp["out_w"], lp["out_b"])
    y = pallas_add_layernorm(out, attn_ln, lp["out_ln_g"], lp["out_ln_b"], eps)
    return y.reshape(b, m, seq, dim)


def bert_graph_encoder(params, hidden_states, attention_mask, sim_graph, fea_shape,
                       head_mask=None):
    """Pallas forward of BertGraphEncoder. Returns (hidden_states,)."""
    b, m, seq, dim = fea_shape
    cfg = params["config"]
    nH = cfg["num_attention_heads"]

    # Additive attention biases are identical for every layer (masked_fill in the
    # reference is out-of-place), so build them once.
    mask_sim = jnp.transpose(attention_mask, (0, 2, 1)).reshape(b * seq, m)
    mask_sim = jnp.broadcast_to(mask_sim[:, None, None, :], (b * seq, nH, m, m))
    sg = jnp.where(mask_sim == 0, 0.0, sim_graph)
    sim_bias = ((1.0 - sg) * -10000.0).reshape(b * seq * nH, m, m)

    mask_seq = attention_mask.reshape(b * m, seq).astype(jnp.float32)
    seq_bias = (1.0 - mask_seq) * -10000.0
    seq_bias = jnp.broadcast_to(seq_bias[:, None, None, :], (b * m, nH, 1, seq))
    seq_bias = seq_bias.reshape(b * m * nH, 1, seq)

    # TODO(synk): dropout (eval-mode identity) and non-None head_mask are omitted.
    for lp in params["layers"]:
        hidden_states = bert_graph_layer(lp, hidden_states, sim_bias, seq_bias,
                                         fea_shape, cfg)
    return (hidden_states,)


# ---------------------------------------------------------------------------
# pure-JAX reference (mirrors the PyTorch module exactly, exact erf gelu)
# ---------------------------------------------------------------------------
def reference_encoder(params, hidden_states, attention_mask, sim_graph, fea_shape):
    b, m, seq, dim = fea_shape
    cfg = params["config"]
    nH = cfg["num_attention_heads"]
    hd = dim // nH
    eps = cfg["layer_norm_eps"]
    max_rel = cfg["max_relative_position"]

    def lin(x, w, bia):
        return x @ w.T + bia

    def split(x, B, L):
        return jnp.transpose(x.reshape(B, L, nH, hd), (0, 2, 1, 3))

    def gelu(x):
        return x * 0.5 * (1.0 + jax.scipy.special.erf(x / math.sqrt(2.0)))

    def layer_norm(x, g, bta):
        mu = x.mean(-1, keepdims=True)
        var = ((x - mu) ** 2).mean(-1, keepdims=True)
        return (x - mu) / jnp.sqrt(var + eps) * g + bta

    hs_cur = hidden_states
    for lp in params["layers"]:
        x_in = hs_cur
        hs = jnp.transpose(x_in, (0, 2, 1, 3)).reshape(b * seq, m, dim)
        q = split(lin(hs, lp["q_sim_w"], lp["q_sim_b"]), b * seq, m)
        k = split(lin(hs, lp["k_sim_w"], lp["k_sim_b"]), b * seq, m)
        v = split(lin(hs, lp["v_sim_w"], lp["v_sim_b"]), b * seq, m)
        scores = jnp.einsum("bhqd,bhkd->bhqk", q, k) / math.sqrt(hd)
        mask_sim = jnp.transpose(attention_mask, (0, 2, 1)).reshape(b * seq, m)
        mask_sim = jnp.broadcast_to(mask_sim[:, None, None, :], (b * seq, nH, m, m))
        sg = jnp.where(mask_sim == 0, 0.0, sim_graph)
        scores = scores + (1.0 - sg) * -10000.0
        probs = jax.nn.softmax(scores, axis=-1)
        ctx = jnp.einsum("bhqk,bhkd->bhqd", probs, v)
        ctx = jnp.transpose(ctx, (0, 2, 1, 3)).reshape(b * seq, m, dim)
        hs2 = jnp.transpose(ctx.reshape(b, seq, m, dim), (0, 2, 1, 3)).reshape(b * m, seq, dim)
        q2 = split(lin(hs2, lp["q_seq_w"], lp["q_seq_b"]), b * m, seq)
        k2 = split(lin(hs2, lp["k_seq_w"], lp["k_seq_b"]), b * m, seq)
        v2 = split(lin(hs2, lp["v_seq_w"], lp["v_seq_b"]), b * m, seq)
        rel_k = _relative_position_table(lp["rel_k_table"], seq, max_rel)
        rel_v = _relative_position_table(lp["rel_v_table"], seq, max_rel)
        scores2 = jnp.einsum("bhqd,bhkd->bhqk", q2, k2)
        scores2 = scores2 + jnp.einsum("bhqd,qkd->bhqk", q2, rel_k)
        scores2 = scores2 / math.sqrt(hd)
        mask_seq = attention_mask.reshape(b * m, seq)
        scores2 = scores2 + (1.0 - mask_seq)[:, None, None, :] * -10000.0
        probs2 = jax.nn.softmax(scores2, axis=-1)
        ctx2 = jnp.einsum("bhqk,bhkd->bhqd", probs2, v2)
        ctx2 = ctx2 + jnp.einsum("bhqk,qkd->bhqd", probs2, rel_v)
        ctx2 = jnp.transpose(ctx2, (0, 2, 1, 3)).reshape(b, m, seq, dim)
        attn_out = layer_norm(lin(ctx2, lp["attn_out_w"], lp["attn_out_b"]) + x_in,
                              lp["attn_ln_g"], lp["attn_ln_b"])
        inter = gelu(lin(attn_out, lp["inter_w"], lp["inter_b"]))
        out = lin(inter, lp["out_w"], lp["out_b"])
        hs_cur = layer_norm(out + attn_out, lp["out_ln_g"], lp["out_ln_b"])
    return hs_cur


# ---------------------------------------------------------------------------
# deterministic parameter init (PyTorch Linear-style uniform)
# ---------------------------------------------------------------------------
def init_params(key, cfg):
    H = cfg["hidden_size"]
    inter = cfg["intermediate_size"]
    hd = H // cfg["num_attention_heads"]
    max_rel = cfg["max_relative_position"]

    def dense(k, out_f, in_f):
        k1, k2 = jax.random.split(k)
        bound = 1.0 / math.sqrt(in_f)
        w = jax.random.uniform(k1, (out_f, in_f), jnp.float32, -bound, bound)
        b = jax.random.uniform(k2, (out_f,), jnp.float32, -bound, bound)
        return w, b

    layers = []
    for _ in range(cfg["num_hidden_layers"]):
        key, *ks = jax.random.split(key, 14)
        lp = {}
        lp["q_sim_w"], lp["q_sim_b"] = dense(ks[0], H, H)
        lp["k_sim_w"], lp["k_sim_b"] = dense(ks[1], H, H)
        lp["v_sim_w"], lp["v_sim_b"] = dense(ks[2], H, H)
        lp["q_seq_w"], lp["q_seq_b"] = dense(ks[3], H, H)
        lp["k_seq_w"], lp["k_seq_b"] = dense(ks[4], H, H)
        lp["v_seq_w"], lp["v_seq_b"] = dense(ks[5], H, H)
        lp["rel_k_table"] = 0.2 * jax.random.normal(ks[6], (2 * max_rel + 1, hd), jnp.float32)
        lp["rel_v_table"] = 0.2 * jax.random.normal(ks[7], (2 * max_rel + 1, hd), jnp.float32)
        lp["attn_out_w"], lp["attn_out_b"] = dense(ks[8], H, H)
        lp["attn_ln_g"] = 1.0 + 0.1 * jax.random.normal(ks[9], (H,), jnp.float32)
        lp["attn_ln_b"] = 0.1 * jax.random.normal(ks[10], (H,), jnp.float32)
        lp["inter_w"], lp["inter_b"] = dense(ks[11], inter, H)
        lp["out_w"], lp["out_b"] = dense(ks[12], H, inter)
        key, k_g, k_b = jax.random.split(key, 3)
        lp["out_ln_g"] = 1.0 + 0.1 * jax.random.normal(k_g, (H,), jnp.float32)
        lp["out_ln_b"] = 0.1 * jax.random.normal(k_b, (H,), jnp.float32)
        layers.append(lp)
    return {"config": cfg, "layers": layers}


if __name__ == "__main__":
    cfg = dict(hidden_size=32, num_attention_heads=4, intermediate_size=64,
               num_hidden_layers=2, max_relative_position=4,
               layer_norm_eps=1e-12, hidden_act="gelu")
    b, m, seq, dim = 2, 4, 8, cfg["hidden_size"]
    fea_shape = (b, m, seq, dim)

    key = jax.random.PRNGKey(0)
    k_par, k_h, k_mask, k_sim = jax.random.split(key, 4)

    params = init_params(k_par, cfg)
    hidden_states = 0.5 * jax.random.normal(k_h, (b, m, seq, dim), jnp.float32)
    attention_mask = (jax.random.uniform(k_mask, (b, m, seq)) > 0.2).astype(jnp.float32)
    sim_graph = jax.random.uniform(
        k_sim, (b * seq, cfg["num_attention_heads"], m, m), dtype=jnp.float32)
    head_mask = [None] * cfg["num_hidden_layers"]

    out = bert_graph_encoder(params, hidden_states, attention_mask, sim_graph,
                             fea_shape, head_mask)[0]
    out = jax.block_until_ready(out)

    ref = reference_encoder(params, hidden_states, attention_mask, sim_graph, fea_shape)
    assert out.shape == (b, m, seq, dim)
    assert jnp.allclose(out, ref, atol=2e-2, rtol=2e-2), \
        float(jnp.max(jnp.abs(out - ref)))

    print("KERNEL_OK")
</pallas_src>

<mosaic_0001>
module attributes {stable_mosaic.version = 11 : i64} {
  func.func @_linear_kernel(%arg0: i32, %arg1: i32, %arg2: i32, %arg3: memref<64x32xf32, #tpu.memory_space<vmem>>, %arg4: memref<32x32xf32, #tpu.memory_space<vmem>>, %arg5: memref<1x32xf32, #tpu.memory_space<vmem>>, %arg6: memref<64x32xf32, #tpu.memory_space<vmem>>, %arg7: memref<64x32xf32, #tpu.memory_space<vmem>>) attributes {dimension_semantics = [#tpu.dimension_semantics<parallel>, #tpu.dimension_semantics<parallel>, #tpu.dimension_semantics<arbitrary>], iteration_bounds = array<i64: 1, 1, 1>, scalar_prefetch = 0 : i64, scratch_operands = 1 : i64, tpu.core_type = #tpu.core_type<tc>, window_params = [{transform_indices = @transform_0, window_bounds = array<i64: 64, 32>}, {transform_indices = @transform_1, window_bounds = array<i64: 32, 32>}, {transform_indices = @transform_2, window_bounds = array<i64: 1, 32>}, {transform_indices = @transform_3, window_bounds = array<i64: 64, 32>}]} {
    %c0_i32 = arith.constant 0 : i32
    %0 = arith.cmpi eq, %arg2, %c0_i32 : i32
    %1 = arith.extui %0 : i1 to i32
    %c0_i32_0 = arith.constant 0 : i32
    %2 = arith.cmpi ne, %1, %c0_i32_0 : i32
    scf.if %2 {
      %cst_10 = arith.constant 0.000000e+00 : f32
      %12 = vector.broadcast %cst_10 : f32 to vector<64x32xf32>
      %c0_11 = arith.constant 0 : index
      %c0_12 = arith.constant 0 : index
      %13 = vector.load %arg7[%c0_11, %c0_12] : memref<64x32xf32, #tpu.memory_space<vmem>>, vector<64x32xf32>
      tpu.vector_store %arg7[%c0_11, %c0_12], %12 {strides = array<i32>} : memref<64x32xf32, #tpu.memory_space<vmem>>, vector<64x32xf32>,
    } else {
    }
    %c0 = arith.constant 0 : index
    %c0_1 = arith.constant 0 : index
    %3 = vector.load %arg7[%c0, %c0_1] : memref<64x32xf32, #tpu.memory_space<vmem>>, vector<64x32xf32>
    %c0_2 = arith.constant 0 : index
    %c0_3 = arith.constant 0 : index
    %4 = vector.load %arg3[%c0_2, %c0_3] : memref<64x32xf32, #tpu.memory_space<vmem>>, vector<64x32xf32>
    %c0_4 = arith.constant 0 : index
    %c0_5 = arith.constant 0 : index
    %5 = vector.load %arg4[%c0_4, %c0_5] : memref<32x32xf32, #tpu.memory_space<vmem>>, vector<32x32xf32>
    %cst = arith.constant dense<0.000000e+00> : vector<64x32xf32>
    %6 = tpu.matmul %4, %5, %cst {dimension_numbers = #tpu.dot_dimension_numbers<[1], [1], [0], [0], [0, 0, 1, 0], [], []>, precision = #tpu.contract_precision<fp32>} : vector<64x32xf32>, vector<32x32xf32>, vector<64x32xf32> -> vector<64x32xf32>
    %7 = arith.addf %3, %6 : vector<64x32xf32>
    %c0_6 = arith.constant 0 : index
    %c0_7 = arith.constant 0 : index
    %8 = vector.load %arg7[%c0_6, %c0_7] : memref<64x32xf32, #tpu.memory_space<vmem>>, vector<64x32xf32>
    tpu.vector_store %arg7[%c0_6, %c0_7], %7 {strides = array<i32>} : memref<64x32xf32, #tpu.memory_space<vmem>>, vector<64x32xf32>,
    %c0_i32_8 = arith.constant 0 : i32
    %9 = arith.cmpi eq, %arg2, %c0_i32_8 : i32
    %10 = arith.extui %9 : i1 to i32
    %c0_i32_9 = arith.constant 0 : i32
    %11 = arith.cmpi ne, %10, %c0_i32_9 : i32
    scf.if %11 {
      %c0_10 = arith.constant 0 : index
      %c0_11 = arith.constant 0 : index
      %12 = vector.load %arg7[%c0_10, %c0_11] : memref<64x32xf32, #tpu.memory_space<vmem>>, vector<64x32xf32>
      %c0_12 = arith.constant 0 : index
      %c0_13 = arith.constant 0 : index
      %13 = vector.load %arg5[%c0_12, %c0_13] : memref<1x32xf32, #tpu.memory_space<vmem>>, vector<1x32xf32>
      %14 = vector.broadcast %13 : vector<1x32xf32> to vector<64x32xf32>
      %15 = arith.addf %12, %14 : vector<64x32xf32>
      %c0_14 = arith.constant 0 : index
      %c0_15 = arith.constant 0 : index
      %16 = vector.load %arg6[%c0_14, %c0_15] : memref<64x32xf32, #tpu.memory_space<vmem>>, vector<64x32xf32>
      tpu.vector_store %arg6[%c0_14, %c0_15], %15 {strides = array<i32>} : memref<64x32xf32, #tpu.memory_space<vmem>>, vector<64x32xf32>,
    } else {
    }
    return
  }
  func.func @transform_0(%arg0: i32, %arg1: i32, %arg2: i32) -> (i32, i32) {
    %c0_i32 = arith.constant 0 : i32
    return %arg0, %arg2 : i32, i32
  }
  func.func @transform_1(%arg0: i32, %arg1: i32, %arg2: i32) -> (i32, i32) {
    %c0_i32 = arith.constant 0 : i32
    return %arg1, %arg2 : i32, i32
  }
  func.func @transform_2(%arg0: i32, %arg1: i32, %arg2: i32) -> (i32, i32) {
    %c0_i32 = arith.constant 0 : i32
    %c0_i32_0 = arith.constant 0 : i32
    return %c0_i32, %arg1 : i32, i32
  }
  func.func @transform_3(%arg0: i32, %arg1: i32, %arg2: i32) -> (i32, i32) {
    %c0_i32 = arith.constant 0 : i32
    return %arg0, %arg1 : i32, i32
  }
}

</mosaic_0001>

<bundles_post_ra>
// kernel: tpu_custom_call.1
= control target key start
LH: loop header
LB: loop body
LE: loop exit
PB: predicated region body
PF: predicated region fallthrough
CT: control target
= control target key end

     0   :  { %vm18_vm0 = vcmask 261120   ;;  %s840_s1 = inlined_call_operand.vmem [shape: f32[32,32], index: 1, kind: input, shape index: {}]   ;;  %s841_s0 = inlined_call_operand.vmem [shape: f32[64,32], index: 0, kind: input, shape index: {}]   ;;  %s842_s2 = inlined_call_operand.vmem [shape: f32[1,32], index: 2, kind: input, shape index: {}]   ;;  %s843_s3 = inlined_call_operand.vmem [shape: f32[64,32], index: 3, kind: output, shape index: {}]  }
   0x1   :  { %v46_v0 = vld [vmem:[%s840_s1 + $0x18] sm:$0xff]  ;;  %v45_v1 = vld [vmem:[%s840_s1 + $0x10] sm:$0xff]  ;;  %v44_v2 = vld [vmem:[%s840_s1 + $0x8] sm:$0xff] }
   0x2   :  { %v82_v3 = vsel %vm18_vm0, %v46_v0, 0  ;;  %v79_v4 = vsel %vm18_vm0, %v45_v1, 0  ;;  %v76_v5 = vsel %vm18_vm0, %v44_v2, 0  ;;  %v43_v6 = vld [vmem:[%s840_s1] sm:$0xff]  ;;  %v40_v8 = vld [vmem:[%s841_s0 + $0x28] sm:$0xff]  ;;  %v41_v33 = vld [vmem:[%s841_s0 + $0x30] sm:$0xff] }
   0x3   :  { %v39_v7 = vld [vmem:[%s841_s0 + $0x20] sm:$0xff]  ;;  %v589_v9 = vand.u32 4294901760, %v82_v3  ;;  %v591_v10 = vand.u32 4294901760, %v79_v4  ;;  %v593_v11 = vand.u32 4294901760, %v76_v5  ;;  %v73_v12 = vsel %vm18_vm0, %v43_v6, 0  ;;  %v36_v34 = vld [vmem:[%s841_s0 + $0x8] sm:$0xff] }
   0x4   :  { %v35_v13 = vld [vmem:[%s841_s0] sm:$0xff]  ;;  %v599_v14 = vand.u32 4294901760, %v73_v12  ;;  %v61_v15 = vsel %vm18_vm0, %v39_v7, 0  ;;  %v64_v16 = vsel %vm18_vm0, %v40_v8, 0  ;;  %v67_v39 = vsel %vm18_vm0, %v41_v33, 0  ;;  %v37_v44 = vld [vmem:[%s841_s0 + $0x10] sm:$0xff] }
   0x5   :  { %v49_v17 = vsel %vm18_vm0, %v35_v13, 0  ;;  %537 = vmatpush.xpose.msra.mxu2 %v589_v9  ;;  %v182_v18 = vsub.f32 %v82_v3, %v589_v9  ;;  %v607_v19 = vsub.f32 %v79_v4, %v591_v10  ;;  %v609_v20 = vand.u32 4294901760, %v61_v15  ;;  %97 = vmatpush.xpose.msra.mxu0 %v589_v9  ;;  %v42_v54 = vld [vmem:[%s841_s0 + $0x38] sm:$0xff] }
   0x6   :  { %v613_v21 = vsub.f32 %v76_v5, %v593_v11  ;;  %v615_v22 = vand.u32 4294901760, %v49_v17  ;;  %v622_v26 = vsub.f32 %v73_v12, %v599_v14  ;;  %v624_v27 = vand.u32 4294901760, %v64_v16  ;;  %v38_v62 = vld [vmem:[%s841_s0 + $0x18] sm:$0xff] }
   0x7   :  { %v183_v23 = vand.u32 4294901760, %v182_v18  ;;  %v189_v24 = vand.u32 4294901760, %v607_v19  ;;  %v619_v25 = vsub.f32 %v61_v15, %v609_v20  ;;  %v52_v43 = vsel %vm18_vm0, %v36_v34, 0 }
   0x8   :  { %v627_v28 = vsub.f32 %v49_v17, %v615_v22  ;;  %v195_v32 = vand.u32 4294901760, %v613_v21  ;;  %v645_v38 = vsub.f32 %v64_v16, %v624_v27  ;;  %v201_v42 = vand.u32 4294901760, %v622_v26 }
   0x9   :  { %538 = vmatpush.xpose.msra.mxu2 %v591_v10  ;;  %v184_v29 = vsub.f32 %v182_v18, %v183_v23  ;;  %v190_v30 = vsub.f32 %v607_v19, %v189_v24  ;;  %v138_v31 = vand.u32 4294901760, %v619_v25  ;;  %99 = vmatpush.xpose.msra.mxu0 %v591_v10  ;;  %v658_v45 = vand.u32 4294901760, %v52_v43 }
   0xa   :  { %v106_v36 = vand.u32 4294901760, %v627_v28  ;;  %v196_v41 = vsub.f32 %v613_v21, %v195_v32  ;;  %v663_v47 = vand.u32 4294901760, %v67_v39  ;;  %v146_v49 = vand.u32 4294901760, %v645_v38 }
   0xb   :  { %v185_v35 = vand.u32 4294901760, %v184_v29  ;;  %v139_v37 = vsub.f32 %v619_v25, %v138_v31  ;;  %v191_v40 = vand.u32 4294901760, %v190_v30  ;;  %v667_v50 = vsub.f32 %v52_v43, %v658_v45 }
   0xc   :  { %v107_v46 = vsub.f32 %v627_v28, %v106_v36  ;;  %v55_v51 = vsel %vm18_vm0, %v37_v44, 0  ;;  %v197_v52 = vand.u32 4294901760, %v196_v41  ;;  %v202_v53 = vsub.f32 %v622_v26, %v201_v42 }
   0xd   :  { %539 = vmatpush.xpose.msra.mxu2 %v593_v11  ;;  %541 = vmatpush.xpose.msra.mxu3 %v185_v35  ;;  %v140_v48 = vand.u32 4294901760, %v139_v37  ;;  %v114_v56 = vand.u32 4294901760, %v667_v50  ;;  %v677_v57 = vand.u32 4294901760, %v55_v51  ;;  %v147_v58 = vsub.f32 %v645_v38, %v146_v49 }
   0xe   :  { %186 = vmatpush.xpose.msra.mxu1 %v185_v35  ;;  %101 = vmatpush.xpose.msra.mxu0 %v593_v11  ;;  %v108_v55 = vand.u32 4294901760, %v107_v46  ;;  %v683_v59 = vsub.f32 %v67_v39, %v663_v47  ;;  %v203_v60 = vand.u32 4294901760, %v202_v53  ;;  %v70_v61 = vsel %vm18_vm0, %v42_v54, 0 }
   0xf   :  { %v115_v63 = vsub.f32 %v667_v50, %v114_v56  ;;  %v121_v0 = vsub.f32 %v55_v51, %v677_v57  ;;  %v148_v1 = vand.u32 4294901760, %v147_v58  ;;  %v695_v3 = vand.u32 4294901760, %v70_v61 }
  0x10   :  { %v154_v2 = vand.u32 4294901760, %v683_v59  ;;  %v58_v4 = vsel %vm18_vm0, %v38_v62, 0 }
  0x11   :  { %540 = vmatpush.xpose.msra.mxu2 %v599_v14  ;;  %542 = vmatpush.xpose.msra.mxu3 %v191_v40  ;;  %v116_v5 = vand.u32 4294901760, %v115_v63  ;;  %v122_v6 = vand.u32 4294901760, %v121_v0  ;;  %v128_v7 = vand.u32 4294901760, %v58_v4  ;;  %v706_v12 = vsub.f32 %v70_v61, %v695_v3  ;;  %v783_v61 = vld [vmem:[%s842_s2] ss:$0 sm:$0xff] }
  0x12   :  { %192 = vmatpush.xpose.msra.mxu1 %v191_v40  ;;  %103 = vmatpush.xpose.msra.mxu0 %v599_v14  ;;  %v155_v8 = vsub.f32 %v683_v59, %v154_v2 }
  0x13   :  { %v129_v13 = vsub.f32 %v58_v4, %v128_v7  ;;  %v162_v16 = vand.u32 4294901760, %v706_v12 }
  0x14   :  { %141 = vmatmul.f32.vlgmr.msra.gmra.mxu2 %v140_v48  ;;  %v156_v15 = vand.u32 4294901760, %v155_v8 }
  0x15   :  { %252 = vmatpush.xpose.msrb.mxu2 %v182_v18  ;;  %543 = vmatpush.xpose.msra.mxu3 %v197_v52  ;;  %v130_v18 = vand.u32 4294901760, %v129_v13 }
  0x16   :  { %387 = vmatpush.xpose.msrb.mxu0 %v183_v23  ;;  %198 = vmatpush.xpose.msra.mxu1 %v197_v52 }
  0x17   :  { %109 = vmatmul.f32.vlgmr.msra.gmra.mxu0 %v108_v55 }
  0x19   :  { %255 = vmatpush.xpose.msrb.mxu2 %v607_v19  ;;  %544 = vmatpush.xpose.msra.mxu3 %v203_v60  ;;  %v163_v19 = vsub.f32 %v706_v12, %v162_v16 }
  0x1a   :  { %391 = vmatpush.xpose.msrb.mxu0 %v189_v24  ;;  %204 = vmatpush.xpose.msra.mxu1 %v203_v60  ;;  %v547_v24 = vmov 0.0  }
  0x1b   :  { %19 = vst.msk [vmem:[#allocation2] sm:$0xff] %vm18_vm0, %v547_v24 }
  0x1c   :  { %149 = vmatmul.f32.gmra.mxu2 %v148_v1  ;;  %222 = vmatmul.f32.vlgmr.msra.gmra.mxu3 %v609_v20  ;;  %20 = vst.msk [vmem:[#allocation2 + $0x8] sm:$0xff] %vm18_vm0, %v547_v24 }
  0x1d   :  { %316 = vmatpush.xpose.msrb.mxu3 %v589_v9  ;;  %258 = vmatpush.xpose.msrb.mxu2 %v613_v21  ;;  %v164_v21 = vand.u32 4294901760, %v163_v19  ;;  %21 = vst.msk [vmem:[#allocation2 + $0x10] sm:$0xff] %vm18_vm0, %v547_v24 }
  0x1e   :  { %446 = vmatpush.xpose.msrb.mxu1 %v589_v9  ;;  %395 = vmatpush.xpose.msrb.mxu0 %v195_v32  ;;  %v123_v9 = vsub.f32 %v121_v0, %v122_v6  ;;  %22 = vst.msk [vmem:[#allocation2 + $0x18] sm:$0xff] %vm18_vm0, %v547_v24 }
  0x1f   :  { %206 = vmatmul.f32.vlgmr.msra.gmra.mxu1 %v615_v22  ;;  %117 = vmatmul.f32.gmra.mxu0 %v116_v5  ;;  %23 = vst.msk [vmem:[#allocation2 + $0x20] sm:$0xff] %vm18_vm0, %v547_v24 }
  0x20   :  { %v124_v17 = vand.u32 4294901760, %v123_v9  ;;  %24 = vst.msk [vmem:[#allocation2 + $0x28] sm:$0xff] %vm18_vm0, %v547_v24 }
  0x21   :  { %318 = vmatpush.xpose.msrb.mxu3 %v591_v10  ;;  %261 = vmatpush.xpose.msrb.mxu2 %v622_v26  ;;  %25 = vst.msk [vmem:[#allocation2 + $0x30] sm:$0xff] %vm18_vm0, %v547_v24 }
  0x22   :  { %448 = vmatpush.xpose.msrb.mxu1 %v591_v10  ;;  %399 = vmatpush.xpose.msrb.mxu0 %v201_v42  ;;  %v131_v10 = vsub.f32 %v129_v13, %v130_v18  ;;  %26 = vst.msk [vmem:[#allocation2 + $0x38] sm:$0xff] %vm18_vm0, %v547_v24  ;;  %v27_v48 = vld [vmem:[#allocation2] sm:$0xff] }
  0x24   :  { %157 = vmatmul.f32.gmra.mxu2 %v156_v15  ;;  %226 = vmatmul.f32.gmra.mxu3 %v624_v27  ;;  %v132_v23 = vand.u32 4294901760, %v131_v10 }
  0x25   :  { %320 = vmatpush.xpose.msrb.mxu3 %v593_v11 }
  0x26   :  { %450 = vmatpush.xpose.msrb.mxu1 %v593_v11 }
  0x27   :  { %210 = vmatmul.f32.gmra.mxu1 %v658_v45  ;;  %125 = vmatmul.f32.gmra.mxu0 %v124_v17 }
  0x29   :  { %322 = vmatpush.xpose.msrb.mxu3 %v599_v14 }
  0x2a   :  { %452 = vmatpush.xpose.msrb.mxu1 %v599_v14 }
  0x2c   :  { %165 = vmatmul.f32.gmra.mxu2 %v164_v21  ;;  %230 = vmatmul.f32.gmra.mxu3 %v663_v47 }
  0x2f   :  { %214 = vmatmul.f32.gmra.mxu1 %v677_v57  ;;  %133 = vmatmul.f32.gmra.mxu0 %v132_v23 }
  0x34   :  { %234 = vmatmul.f32.gmra.mxu3 %v695_v3  ;;  %264 = vmatmul.f32.vlgmr.msrb.gmra.mxu2 %v627_v28 }
  0x37   :  { %218 = vmatmul.f32.gmra.mxu1 %v128_v7  ;;  %401 = vmatmul.f32.vlgmr.msrb.gmra.mxu0 %v615_v22 }
  0x3c   :  { %269 = vmatmul.f32.gmra.mxu2 %v667_v50  ;;  %326 = vmatmul.f32.vlgmr.msrb.gmra.mxu3 %v106_v36 }
  0x3f   :  { %454 = vmatmul.f32.vlgmr.msrb.gmra.mxu1 %v615_v22  ;;  %405 = vmatmul.f32.gmra.mxu0 %v658_v45 }
  0x44   :  { %274 = vmatmul.f32.gmra.mxu2 %v121_v0  ;;  %332 = vmatmul.f32.gmra.mxu3 %v114_v56 }
  0x47   :  { %458 = vmatmul.f32.gmra.mxu1 %v658_v45  ;;  %409 = vmatmul.f32.gmra.mxu0 %v677_v57 }
  0x4c   :  { %279 = vmatmul.f32.gmra.mxu2 %v129_v13  ;;  %338 = vmatmul.f32.gmra.mxu3 %v122_v6 }
  0x4f   :  { %462 = vmatmul.f32.gmra.mxu1 %v677_v57  ;;  %413 = vmatmul.f32.gmra.mxu0 %v128_v7 }
  0x54   :  { %284 = vmatmul.f32.gmra.mxu2 %v619_v25  ;;  %344 = vmatmul.f32.gmra.mxu3 %v130_v18 }
  0x57   :  { %466 = vmatmul.f32.gmra.mxu1 %v128_v7  ;;  %417 = vmatmul.f32.gmra.mxu0 %v609_v20 }
  0x5c   :  { %289 = vmatmul.f32.gmra.mxu2 %v645_v38  ;;  %350 = vmatmul.f32.gmra.mxu3 %v138_v31 }
  0x5f   :  { %470 = vmatmul.f32.gmra.mxu1 %v609_v20  ;;  %421 = vmatmul.f32.gmra.mxu0 %v624_v27 }
  0x64   :  { %294 = vmatmul.f32.gmra.mxu2 %v683_v59  ;;  %356 = vmatmul.f32.gmra.mxu3 %v146_v49  ;;  %v28_v59 = vld [vmem:[#allocation2 + $0x8] sm:$0xff] }
  0x67   :  { %474 = vmatmul.f32.gmra.mxu1 %v624_v27  ;;  %425 = vmatmul.f32.gmra.mxu0 %v663_v47 }
  0x6c   :  { %299 = vmatmul.f32.gmra.mxu2 %v706_v12  ;;  %362 = vmatmul.f32.gmra.mxu3 %v154_v2  ;;  %v29_v12 = vld [vmem:[#allocation2 + $0x10] sm:$0xff] }
  0x6f   :  { %478 = vmatmul.f32.gmra.mxu1 %v663_v47  ;;  %429 = vmatmul.f32.gmra.mxu0 %v695_v3 }
  0x74   :  { %368 = vmatmul.f32.gmra.mxu3 %v162_v16 }
  0x77   :  { %482 = vmatmul.f32.gmra.mxu1 %v695_v3 }
  0x94   :  { %v110_v11 = vpop.f32.mrf.mxu0 }
  0x97   :  { %v755_v14 = vpop.f32.mrf.mxu2 }
  0x9c   :  { %v207_v20 = vpop.f32.mrf.mxu1  ;;  %v118_v22 = vpop.f32.mrf.mxu0 }
  0x9d   :  { %v208_v40 = vadd.f32 %v207_v20, %v110_v11  ;;  %v30_v20 = vld [vmem:[#allocation2 + $0x18] sm:$0xff] }
  0x9f   :  { %v758_v25 = vpop.f32.mrf.mxu2  ;;  %v760_v26 = vpop.f32.mrf.mxu3 }
  0xa0   :  { %v224_v24 = vadd.f32 %v760_v26, %v755_v14 }
  0xa4   :  { %v211_v27 = vpop.f32.mrf.mxu1  ;;  %v126_v28 = vpop.f32.mrf.mxu0 }
  0xa5   :  { %v212_v49 = vadd.f32 %v211_v27, %v118_v22 }
  0xa7   :  { %v769_v29 = vpop.f32.mrf.mxu2  ;;  %v771_v30 = vpop.f32.mrf.mxu3 }
  0xa8   :  { %v228_v14 = vadd.f32 %v771_v30, %v758_v25 }
  0xac   :  { %v215_v31 = vpop.f32.mrf.mxu1  ;;  %v134_v32 = vpop.f32.mrf.mxu0 }
  0xad   :  { %v216_v60 = vadd.f32 %v215_v31, %v126_v28 }
  0xaf   :  { %v773_v33 = vpop.f32.mrf.mxu2  ;;  %v775_v34 = vpop.f32.mrf.mxu3 }
  0xb0   :  { %v232_v25 = vadd.f32 %v775_v34, %v769_v29  ;;  %v33_v29 = vld [vmem:[#allocation2 + $0x30] sm:$0xff] }
  0xb4   :  { %v219_v35 = vpop.f32.mrf.mxu1  ;;  %v402_v36 = vpop.f32.mrf.mxu0 }
  0xb5   :  { %v220_v9 = vadd.f32 %v219_v35, %v134_v32 }
  0xb7   :  { %v777_v37 = vpop.f32.mrf.mxu3  ;;  %v265_v38 = vpop.f32.mrf.mxu2 }
  0xb8   :  { %v266_v42 = vadd.f32 %v265_v38, %v208_v40  ;;  %v236_v34 = vadd.f32 %v777_v37, %v773_v33 }
  0xbc   :  { %v455_v39 = vpop.f32.mrf.mxu1  ;;  %v406_v41 = vpop.f32.mrf.mxu0 }
  0xbf   :  { %v270_v43 = vpop.f32.mrf.mxu2  ;;  %v327_v44 = vpop.f32.mrf.mxu3 }
  0xc0   :  { %v328_v45 = vadd.f32 %v327_v44, %v266_v42  ;;  %v271_v52 = vadd.f32 %v270_v43, %v212_v49 }
  0xc2   :  { %v403_v46 = vadd.f32 %v402_v36, %v328_v45 }
  0xc4   :  { %v459_v47 = vpop.f32.mrf.mxu1  ;;  %v456_v50 = vadd.f32 %v455_v39, %v403_v46  ;;  %v410_v51 = vpop.f32.mrf.mxu0 }
  0xc6   :  { %v486_v53 = vadd.f32 %v456_v50, %v27_v48 }
  0xc7   :  { %v275_v54 = vpop.f32.mrf.mxu2  ;;  %v333_v55 = vpop.f32.mrf.mxu3 }
  0xc8   :  { %494 = vst.msk [vmem:[#allocation2] sm:$0xff] %vm18_vm0, %v486_v53  ;;  %v334_v56 = vadd.f32 %v333_v55, %v271_v52  ;;  %v276_v63 = vadd.f32 %v275_v54, %v216_v60  ;;  %v32_v52 = vld [vmem:[#allocation2 + $0x28] sm:$0xff] }
  0xca   :  { %v407_v57 = vadd.f32 %v406_v41, %v334_v56  ;;  %v31_v41 = vld [vmem:[#allocation2 + $0x20] sm:$0xff] }
  0xcc   :  { %v463_v58 = vpop.f32.mrf.mxu1  ;;  %v460_v62 = vadd.f32 %v459_v47, %v407_v57  ;;  %v414_v1 = vpop.f32.mrf.mxu0 }
  0xce   :  { %v487_v0 = vadd.f32 %v460_v62, %v28_v59 }
  0xcf   :  { %v505_v2 = vld [vmem:[#allocation2] sm:$0xff]  ;;  %v280_v3 = vpop.f32.mrf.mxu2  ;;  %v339_v4 = vpop.f32.mrf.mxu3 }
  0xd0   :  { %v517_v5 = vadd.f32 %v783_v61, %v505_v2  ;;  %495 = vst.msk [vmem:[#allocation2 + $0x8] sm:$0xff] %vm18_vm0, %v487_v0  ;;  %v340_v6 = vadd.f32 %v339_v4, %v276_v63  ;;  %v281_v15 = vadd.f32 %v280_v3, %v220_v9  ;;  %v34_v9 = vld [vmem:[#allocation2 + $0x38] sm:$0xff] }
  0xd2   :  { %525 = vst.msk [vmem:[%s843_s3] sm:$0xff] %vm18_vm0, %v517_v5  ;;  %v411_v7 = vadd.f32 %v410_v51, %v340_v6 }
  0xd4   :  { %v467_v8 = vpop.f32.mrf.mxu1  ;;  %v464_v13 = vadd.f32 %v463_v58, %v411_v7  ;;  %v418_v23 = vpop.f32.mrf.mxu0 }
  0xd6   :  { %v488_v16 = vadd.f32 %v464_v13, %v29_v12 }
  0xd7   :  { %v506_v17 = vld [vmem:[#allocation2 + $0x8] sm:$0xff]  ;;  %v285_v18 = vpop.f32.mrf.mxu2  ;;  %v345_v19 = vpop.f32.mrf.mxu3 }
  0xd8   :  { %v518_v10 = vadd.f32 %v783_v61, %v506_v17  ;;  %496 = vst.msk [vmem:[#allocation2 + $0x10] sm:$0xff] %vm18_vm0, %v488_v16  ;;  %v346_v21 = vadd.f32 %v345_v19, %v281_v15  ;;  %v286_v28 = vadd.f32 %v285_v18, %v224_v24 }
  0xda   :  { %526 = vst.msk [vmem:[%s843_s3 + $0x8] sm:$0xff] %vm18_vm0, %v518_v10  ;;  %v415_v11 = vadd.f32 %v414_v1, %v346_v21 }
  0xdc   :  { %v471_v22 = vpop.f32.mrf.mxu1  ;;  %v468_v27 = vadd.f32 %v467_v8, %v415_v11  ;;  %v422_v42 = vpop.f32.mrf.mxu0 }
  0xde   :  { %v489_v31 = vadd.f32 %v468_v27, %v30_v20 }
  0xdf   :  { %v507_v32 = vld [vmem:[#allocation2 + $0x10] sm:$0xff]  ;;  %v290_v35 = vpop.f32.mrf.mxu2  ;;  %v351_v36 = vpop.f32.mrf.mxu3 }
  0xe0   :  { %v519_v38 = vadd.f32 %v783_v61, %v507_v32  ;;  %497 = vst.msk [vmem:[#allocation2 + $0x18] sm:$0xff] %vm18_vm0, %v489_v31  ;;  %v352_v39 = vadd.f32 %v351_v36, %v286_v28  ;;  %v291_v44 = vadd.f32 %v290_v35, %v228_v14 }
  0xe2   :  { %527 = vst.msk [vmem:[%s843_s3 + $0x10] sm:$0xff] %vm18_vm0, %v519_v38  ;;  %v419_v40 = vadd.f32 %v418_v23, %v352_v39 }
  0xe4   :  { %v472_v26 = vadd.f32 %v471_v22, %v419_v40  ;;  %v475_v43 = vpop.f32.mrf.mxu1  ;;  %v426_v53 = vpop.f32.mrf.mxu0 }
  0xe6   :  { %v490_v45 = vadd.f32 %v472_v26, %v31_v41 }
  0xe7   :  { %v508_v46 = vld [vmem:[#allocation2 + $0x18] sm:$0xff]  ;;  %v357_v47 = vpop.f32.mrf.mxu3  ;;  %v295_v50 = vpop.f32.mrf.mxu2 }
  0xe8   :  { %v520_v48 = vadd.f32 %v783_v61, %v508_v46  ;;  %498 = vst.msk [vmem:[#allocation2 + $0x20] sm:$0xff] %vm18_vm0, %v490_v45  ;;  %v358_v49 = vadd.f32 %v357_v47, %v291_v44  ;;  %v296_v54 = vadd.f32 %v295_v50, %v232_v25 }
  0xea   :  { %528 = vst.msk [vmem:[%s843_s3 + $0x18] sm:$0xff] %vm18_vm0, %v520_v48  ;;  %v423_v51 = vadd.f32 %v422_v42, %v358_v49 }
  0xec   :  { %v476_v30 = vadd.f32 %v475_v43, %v423_v51  ;;  %v479_v58 = vpop.f32.mrf.mxu1  ;;  %v430_v5 = vpop.f32.mrf.mxu0 }
  0xee   :  { %v491_v55 = vadd.f32 %v476_v30, %v32_v52 }
  0xef   :  { %v509_v56 = vld [vmem:[#allocation2 + $0x20] sm:$0xff]  ;;  %v363_v57 = vpop.f32.mrf.mxu3  ;;  %v300_v63 = vpop.f32.mrf.mxu2 }
  0xf0   :  { %v521_v59 = vadd.f32 %v783_v61, %v509_v56  ;;  %499 = vst.msk [vmem:[#allocation2 + $0x28] sm:$0xff] %vm18_vm0, %v491_v55  ;;  %v364_v60 = vadd.f32 %v363_v57, %v296_v54  ;;  %v301_v1 = vadd.f32 %v300_v63, %v236_v34 }
  0xf2   :  { %529 = vst.msk [vmem:[%s843_s3 + $0x20] sm:$0xff] %vm18_vm0, %v521_v59  ;;  %v427_v62 = vadd.f32 %v426_v53, %v364_v60 }
  0xf4   :  { %v480_v0 = vadd.f32 %v479_v58, %v427_v62  ;;  %v483_v8 = vpop.f32.mrf.mxu1 }
  0xf6   :  { %v492_v2 = vadd.f32 %v480_v0, %v33_v29 }
  0xf7   :  { %v510_v3 = vld [vmem:[#allocation2 + $0x28] sm:$0xff]  ;;  %v369_v4 = vpop.f32.mrf.mxu3 }
  0xf8   :  { %v522_v6 = vadd.f32 %v783_v61, %v510_v3  ;;  %500 = vst.msk [vmem:[#allocation2 + $0x30] sm:$0xff] %vm18_vm0, %v492_v2  ;;  %v370_v7 = vadd.f32 %v369_v4, %v301_v1 }
  0xfa   :  { %530 = vst.msk [vmem:[%s843_s3 + $0x28] sm:$0xff] %vm18_vm0, %v522_v6  ;;  %v431_v12 = vadd.f32 %v430_v5, %v370_v7 }
  0xfc   :  { %v484_v33 = vadd.f32 %v483_v8, %v431_v12 }
  0xfe   :  { %v493_v37 = vadd.f32 %v484_v33, %v34_v9 }
  0xff   :  { %v511_v13 = vld [vmem:[#allocation2 + $0x30] sm:$0xff] }
 0x100   :  { %v523_v15 = vadd.f32 %v783_v61, %v511_v13  ;;  %501 = vst.msk [vmem:[#allocation2 + $0x38] sm:$0xff] %vm18_vm0, %v493_v37 }
 0x102   :  { %531 = vst.msk [vmem:[%s843_s3 + $0x30] sm:$0xff] %vm18_vm0, %v523_v15 }
 0x107   :  { %v512_v16 = vld [vmem:[#allocation2 + $0x38] sm:$0xff] }
 0x108   :  { %v524_v17 = vadd.f32 %v783_v61, %v512_v16 }
 0x10a   :  { %532 = vst.msk [vmem:[%s843_s3 + $0x38] sm:$0xff] %vm18_vm0, %v524_v17 }

</bundles_post_ra>
